<compile_context>
chip_gen: v6e
topology: v6e:2x2x1
jax: 0.10.0
libtpu: 0.0.40
codegen_flags: <defaults>
</compile_context>

<pallas_src>
from functools import partial

import jax
import jax.numpy as jnp
import numpy as np
from jax.experimental import pallas as pl
from jax.experimental.pallas import tpu as pltpu


def _fused_kernel(gdl_fill_ref, logits_ref, label_ref,
                  lsce_ref, nvalid_ref, tcount_ref, inter_ref, psum_ref,
                  *, lb_pos, lb_neg, ignore_index, hw, tile_hw):
    # logits_ref: (1, C, TM) input dtype; label_ref: (1, 1, TM) int32
    x = logits_ref[0].astype(jnp.float32)          # (C, TM) upcast AFTER the DMA
    lbl = label_ref[0]                             # (1, TM)
    C, TM = x.shape

    # Lane mask for the ragged last tile (no wrapper-side padding of logits/labels).
    col = jax.lax.broadcasted_iota(jnp.int32, (1, TM), 1)
    lane_valid = (pl.program_id(1) * tile_hw + col) < hw       # (1, TM) bool

    ignore = lbl == ignore_index                               # (1, TM) bool

    # --- shared softmax over the class (sublane) axis ---
    m = jnp.max(x, axis=0, keepdims=True)                      # (1, TM)
    z = x - m
    ez = jnp.exp(z)
    se = jnp.sum(ez, axis=0, keepdims=True)                    # (1, TM)
    logp = z - jnp.log(se)                                     # (C, TM) log-softmax
    p = ez / se                                                # (C, TM) softmax

    cls = jax.lax.broadcasted_iota(jnp.int32, (C, TM), 0)

    # --- LabelSmoothSoftmaxCE partials (algebraic form, no full target tensor) ---
    lbl_ls = jnp.where(ignore, 0, lbl)                         # label[ignore] = 0
    onehot_ls = cls == lbl_ls                                  # (C, TM)
    sum_logp = jnp.sum(logp, axis=0, keepdims=True)            # (1, TM)
    logp_y = jnp.sum(jnp.where(onehot_ls, logp, 0.0), axis=0, keepdims=True)
    loss = -(lb_neg * sum_logp + (lb_pos - lb_neg) * logp_y)   # (1, TM)
    valid = jnp.logical_and(jnp.logical_not(ignore), lane_valid)
    loss = jnp.where(valid, loss, 0.0)
    lsce_ref[0, 0] = jnp.sum(loss, axis=1, keepdims=True)                  # (1, 1)
    nvalid_ref[0, 0] = jnp.sum(valid.astype(jnp.float32), axis=1, keepdims=True)

    # --- GeneralizedDiceLoss partials ---
    # Ignored pixels are rewritten to gdl_fill (== label.min() in the usual case),
    # matching the PyTorch module's in-place rewrite before one-hot.
    gdl_lbl = jnp.where(ignore, gdl_fill_ref[0], lbl)          # (1, TM)
    onehot_g = jnp.logical_and(cls == gdl_lbl, lane_valid)     # (C, TM)
    onehot_gf = onehot_g.astype(jnp.float32)
    p_masked = jnp.where(lane_valid, p, 0.0)
    tcount_ref[0, 0] = jnp.sum(onehot_gf, axis=1, keepdims=True)            # (C, 1)
    inter_ref[0, 0] = jnp.sum(p_masked * onehot_gf, axis=1, keepdims=True)  # (C, 1)
    psum_ref[0, 0] = jnp.sum(p_masked, axis=1, keepdims=True)               # (C, 1)


def _pick_tile_hw(hw, c, itemsize, vmem_budget=16 * 1024 * 1024):
    # Size the lane tile so double-buffered logits blocks stay within the VMEM budget
    # (safe on v5e/v6e 128 MiB and v7x 64 MiB); cap at 8192 lanes per the roofline.
    max_lanes = max(128, vmem_budget // (2 * c * max(itemsize, 1)))
    tile = int(min(8192, max_lanes))
    tile = max(128, (tile // 128) * 128)
    if hw <= tile:
        return hw          # single full-width block (always layout-legal)
    return tile


def lsce_gd_loss(logits, label, lb_smooth=0.1, ignore_index=255, epsilon=1e-6):
    """logits: (N, C, H, W) float; label: (N, H, W) int.  Returns LSCE + GDL scalar."""
    N, C, H, W = logits.shape
    HW = H * W

    # Free reshapes only (no transpose / copy / pad / dtype change).
    logits_r = logits.reshape(N, C, HW)
    label_r = label.reshape(N, 1, HW).astype(jnp.int32)

    # GDL ignore-label rewrite value: target[target==ignore] = target.min()
    # unless ignore_index in range(target.min(), target.max()).
    t_min = jnp.min(label_r).astype(jnp.int32)
    t_max = jnp.max(label_r).astype(jnp.int32)
    in_range = jnp.logical_and(ignore_index >= t_min, ignore_index < t_max)
    gdl_fill = jnp.where(in_range, jnp.int32(ignore_index), t_min).reshape(1)

    itemsize = jnp.dtype(logits.dtype).itemsize
    tile_hw = _pick_tile_hw(HW, C, itemsize)
    n_t = pl.cdiv(HW, tile_hw)

    lb_pos = 1.0 - lb_smooth
    lb_neg = lb_smooth / C

    kernel = partial(_fused_kernel, lb_pos=lb_pos, lb_neg=lb_neg,
                     ignore_index=ignore_index, hw=HW, tile_hw=tile_hw)

    scalar_block = pl.BlockSpec((1, 1, 1, 1), lambda n, i, fill: (n, i, 0, 0))
    class_block = pl.BlockSpec((1, 1, C, 1), lambda n, i, fill: (n, i, 0, 0))

    lsce_p, nvalid_p, tcount_p, inter_p, psum_p = pl.pallas_call(
        kernel,
        out_shape=(
            jax.ShapeDtypeStruct((N, n_t, 1, 1), jnp.float32),   # LSCE loss partial sums
            jax.ShapeDtypeStruct((N, n_t, 1, 1), jnp.float32),   # n_valid partial counts
            jax.ShapeDtypeStruct((N, n_t, C, 1), jnp.float32),   # per-class one-hot counts
            jax.ShapeDtypeStruct((N, n_t, C, 1), jnp.float32),   # per-class intersect
            jax.ShapeDtypeStruct((N, n_t, C, 1), jnp.float32),   # per-class softmax sums
        ),
        grid_spec=pltpu.PrefetchScalarGridSpec(
            num_scalar_prefetch=1,
            grid=(N, n_t),
            in_specs=[
                pl.BlockSpec((1, C, tile_hw), lambda n, i, fill: (n, 0, i)),
                pl.BlockSpec((1, 1, tile_hw), lambda n, i, fill: (n, 0, i)),
            ],
            out_specs=[scalar_block, scalar_block,
                       class_block, class_block, class_block],
        ),
        compiler_params=pltpu.CompilerParams(
            dimension_semantics=("parallel", "parallel"),
            vmem_limit_bytes=32 * 1024 * 1024),
    )(gdl_fill, logits_r, label_r)

    # --- LabelSmoothSoftmaxCE, reduction='mean' (as used by LSCE_GDLoss) ---
    n_valid = jnp.sum(nvalid_p)
    lsce = jnp.sum(lsce_p) / n_valid   # NaN if every pixel is ignored (same as PyTorch)

    # --- GeneralizedDiceLoss final scalar algebra ---
    t_l = jnp.sum(tcount_p, axis=(0, 1, 3))            # (C,)
    intersect_l = jnp.sum(inter_p, axis=(0, 1, 3))     # (C,)
    pred_sum_l = jnp.sum(psum_p, axis=(0, 1, 3))       # (C,)
    w_l = 1.0 / jnp.maximum(t_l * t_l, epsilon)
    intersect = intersect_l * w_l
    denominator = jnp.maximum((pred_sum_l + t_l) * w_l, epsilon)
    gdl = 1.0 - 2.0 * (jnp.sum(intersect) / jnp.sum(denominator))

    return lsce + gdl


def _reference(logits, label, lb_smooth=0.1, ignore_index=255, epsilon=1e-6):
    """Pure-JAX mirror of LSCE_GDLoss (minus the undefined HDDTBinaryLoss term)."""
    N, C, H, W = logits.shape
    logits = logits.astype(jnp.float32)
    ignore = label == ignore_index

    # LabelSmoothSoftmaxCE (mean)
    n_valid = jnp.sum(jnp.logical_not(ignore))
    lbl0 = jnp.where(ignore, 0, label)
    lb_pos, lb_neg = 1.0 - lb_smooth, lb_smooth / C
    onehot = jax.nn.one_hot(lbl0, C, axis=1)
    tgt = onehot * lb_pos + (1.0 - onehot) * lb_neg
    logs = jax.nn.log_softmax(logits, axis=1)
    loss = -jnp.sum(logs * tgt, axis=1)
    loss = jnp.where(ignore, 0.0, loss)
    lsce = jnp.sum(loss) / n_valid

    # GeneralizedDiceLoss
    t_min, t_max = jnp.min(label), jnp.max(label)
    in_range = jnp.logical_and(ignore_index >= t_min, ignore_index < t_max)
    fill = jnp.where(in_range, jnp.int32(ignore_index), t_min.astype(jnp.int32))
    gdl_lbl = jnp.where(ignore, fill, label)
    oh = jax.nn.one_hot(gdl_lbl, C, axis=1)
    probs = jax.nn.softmax(logits, axis=1)
    p_flat = jnp.transpose(probs, (1, 0, 2, 3)).reshape(C, -1)
    t_flat = jnp.transpose(oh, (1, 0, 2, 3)).reshape(C, -1)
    t_l = jnp.sum(t_flat, axis=-1)
    w_l = 1.0 / jnp.maximum(t_l * t_l, epsilon)
    inter = jnp.sum(p_flat * t_flat, axis=-1) * w_l
    denom = jnp.maximum(jnp.sum(p_flat + t_flat, axis=-1) * w_l, epsilon)
    gdl = 1.0 - 2.0 * (jnp.sum(inter) / jnp.sum(denom))
    return lsce + gdl


if __name__ == "__main__":
    key = jax.random.PRNGKey(0)
    k_logit, k_label, k_ign = jax.random.split(key, 3)

    N, C, H, W = 2, 4, 16, 16
    logits = jax.random.normal(k_logit, (N, C, H, W), dtype=jnp.float32)
    label = jax.random.randint(k_label, (N, H, W), 0, C, dtype=jnp.int32)
    # sprinkle some ignored pixels (ignore_index = 255)
    ign_mask = jax.random.bernoulli(k_ign, 0.1, (N, H, W))
    label = jnp.where(ign_mask, 255, label)

    out = lsce_gd_loss(logits, label, lb_smooth=0.1, ignore_index=255)
    out = jax.block_until_ready(out)

    ref = _reference(logits, label, lb_smooth=0.1, ignore_index=255)
    np.testing.assert_allclose(np.asarray(out), np.asarray(ref),
                               rtol=1e-5, atol=1e-5)

    print("KERNEL_OK")
</pallas_src>

<mosaic_0001>
module attributes {stable_mosaic.version = 11 : i64} {
  func.func @_fused_kernel(%arg0: i32, %arg1: i32, %arg2: memref<1xi32, #tpu.memory_space<smem>>, %arg3: memref<1x4x256xf32, #tpu.memory_space<vmem>>, %arg4: memref<1x1x256xi32, #tpu.memory_space<vmem>>, %arg5: memref<1x1x1x1xf32, #tpu.memory_space<vmem>>, %arg6: memref<1x1x1x1xf32, #tpu.memory_space<vmem>>, %arg7: memref<1x1x4x1xf32, #tpu.memory_space<vmem>>, %arg8: memref<1x1x4x1xf32, #tpu.memory_space<vmem>>, %arg9: memref<1x1x4x1xf32, #tpu.memory_space<vmem>>) attributes {dimension_semantics = [#tpu.dimension_semantics<parallel>, #tpu.dimension_semantics<parallel>], iteration_bounds = array<i64: 2, 1>, scalar_prefetch = 1 : i64, scratch_operands = 0 : i64, tpu.core_type = #tpu.core_type<tc>, window_params = [{transform_indices = @transform_0, window_bounds = array<i64: 1, 4, 256>}, {transform_indices = @transform_1, window_bounds = array<i64: 1, 1, 256>}, {transform_indices = @transform_2, window_bounds = array<i64: 1, 1, 1, 1>}, {transform_indices = @transform_3, window_bounds = array<i64: 1, 1, 1, 1>}, {transform_indices = @transform_4, window_bounds = array<i64: 1, 1, 4, 1>}, {transform_indices = @transform_5, window_bounds = array<i64: 1, 1, 4, 1>}, {transform_indices = @transform_6, window_bounds = array<i64: 1, 1, 4, 1>}]} {
    %c0 = arith.constant 0 : index
    %c0_0 = arith.constant 0 : index
    %c0_1 = arith.constant 0 : index
    %0 = vector.load %arg3[%c0, %c0_0, %c0_1] : memref<1x4x256xf32, #tpu.memory_space<vmem>>, vector<1x4x256xf32>
    %1 = vector.shape_cast %0 : vector<1x4x256xf32> to vector<4x256xf32>
    %c0_2 = arith.constant 0 : index
    %c0_3 = arith.constant 0 : index
    %c0_4 = arith.constant 0 : index
    %2 = vector.load %arg4[%c0_2, %c0_3, %c0_4] : memref<1x1x256xi32, #tpu.memory_space<vmem>>, vector<1x1x256xi32>
    %3 = vector.shape_cast %2 : vector<1x1x256xi32> to vector<1x256xi32>
    %4 = tpu.iota {dimensions = array<i32: 1>} : vector<1x256xi32>
    %c256_i32 = arith.constant 256 : i32
    %5 = arith.muli %arg1, %c256_i32 : i32
    %6 = vector.broadcast %5 : i32 to vector<1x256xi32>
    %7 = arith.addi %6, %4 : vector<1x256xi32>
    %c256_i32_5 = arith.constant 256 : i32
    %8 = vector.broadcast %c256_i32_5 : i32 to vector<1x256xi32>
    %9 = arith.cmpi slt, %7, %8 : vector<1x256xi32>
    %c255_i32 = arith.constant 255 : i32
    %10 = vector.broadcast %c255_i32 : i32 to vector<1x256xi32>
    %11 = arith.cmpi eq, %3, %10 : vector<1x256xi32>
    %cst = arith.constant dense<0xFF800000> : vector<256xf32>
    %12 = vector.multi_reduction <maximumf>, %1, %cst [0] : vector<4x256xf32> to vector<256xf32>
    %13 = vector.shape_cast %12 : vector<256xf32> to vector<1x256xf32>
    %14 = vector.broadcast %13 : vector<1x256xf32> to vector<4x256xf32>
    %15 = arith.subf %1, %14 : vector<4x256xf32>
    %16 = math.exp %15 : vector<4x256xf32>
    %cst_6 = arith.constant dense<0.000000e+00> : vector<256xf32>
    %17 = vector.multi_reduction <add>, %16, %cst_6 [0] : vector<4x256xf32> to vector<256xf32>
    %18 = vector.shape_cast %17 : vector<256xf32> to vector<1x256xf32>
    %19 = math.log %18 : vector<1x256xf32>
    %20 = vector.broadcast %19 : vector<1x256xf32> to vector<4x256xf32>
    %21 = arith.subf %15, %20 : vector<4x256xf32>
    %22 = vector.broadcast %18 : vector<1x256xf32> to vector<4x256xf32>
    %23 = arith.divf %16, %22 : vector<4x256xf32>
    %24 = tpu.iota {dimensions = array<i32: 0>} : vector<4x256xi32>
    %c0_i32 = arith.constant 0 : i32
    %25 = vector.broadcast %c0_i32 : i32 to vector<1x256xi32>
    %26 = arith.select %11, %25, %3 : vector<1x256xi1>, vector<1x256xi32>
    %27 = vector.broadcast %26 : vector<1x256xi32> to vector<4x256xi32>
    %28 = arith.cmpi eq, %24, %27 : vector<4x256xi32>
    %cst_7 = arith.constant dense<0.000000e+00> : vector<256xf32>
    %29 = vector.multi_reduction <add>, %21, %cst_7 [0] : vector<4x256xf32> to vector<256xf32>
    %30 = vector.shape_cast %29 : vector<256xf32> to vector<1x256xf32>
    %cst_8 = arith.constant 0.000000e+00 : f32
    %31 = vector.broadcast %cst_8 : f32 to vector<4x256xf32>
    %32 = arith.select %28, %21, %31 : vector<4x256xi1>, vector<4x256xf32>
    %cst_9 = arith.constant dense<0.000000e+00> : vector<256xf32>
    %33 = vector.multi_reduction <add>, %32, %cst_9 [0] : vector<4x256xf32> to vector<256xf32>
    %34 = vector.shape_cast %33 : vector<256xf32> to vector<1x256xf32>
    %cst_10 = arith.constant 2.500000e-02 : f32
    %35 = vector.broadcast %cst_10 : f32 to vector<1x256xf32>
    %36 = arith.mulf %35, %30 : vector<1x256xf32>
    %cst_11 = arith.constant 8.750000e-01 : f32
    %37 = vector.broadcast %cst_11 : f32 to vector<1x256xf32>
    %38 = arith.mulf %37, %34 : vector<1x256xf32>
    %39 = arith.addf %36, %38 : vector<1x256xf32>
    %cst_12 = arith.constant 0.000000e+00 : f32
    %40 = vector.broadcast %cst_12 : f32 to vector<1x256xf32>
    %41 = arith.subf %40, %39 : vector<1x256xf32>
    %cst_13 = arith.constant dense<true> : vector<1x256xi1>
    %42 = arith.xori %11, %cst_13 : vector<1x256xi1>
    %43 = arith.andi %42, %9 : vector<1x256xi1>
    %cst_14 = arith.constant 0.000000e+00 : f32
    %44 = vector.broadcast %cst_14 : f32 to vector<1x256xf32>
    %45 = arith.select %43, %41, %44 : vector<1x256xi1>, vector<1x256xf32>
    %cst_15 = arith.constant dense<0.000000e+00> : vector<1xf32>
    %46 = vector.multi_reduction <add>, %45, %cst_15 [1] : vector<1x256xf32> to vector<1xf32>
    %47 = vector.shape_cast %46 : vector<1xf32> to vector<1x1xf32>
    %c0_16 = arith.constant 0 : index
    %c0_17 = arith.constant 0 : index
    %c0_18 = arith.constant 0 : index
    %c0_19 = arith.constant 0 : index
    %48 = vector.load %arg5[%c0_16, %c0_17, %c0_18, %c0_19] : memref<1x1x1x1xf32, #tpu.memory_space<vmem>>, vector<1x1x1x1xf32>
    %49 = vector.shape_cast %48 : vector<1x1x1x1xf32> to vector<1x1xf32>
    %50 = vector.shape_cast %47 : vector<1x1xf32> to vector<1x1x1x1xf32>
    tpu.vector_store %arg5[%c0_16, %c0_17, %c0_18, %c0_19], %50 {strides = array<i32>} : memref<1x1x1x1xf32, #tpu.memory_space<vmem>>, vector<1x1x1x1xf32>,
    %51 = arith.extui %43 : vector<1x256xi1> to vector<1x256xi32>
    %52 = arith.sitofp %51 : vector<1x256xi32> to vector<1x256xf32>
    %cst_20 = arith.constant dense<0.000000e+00> : vector<1xf32>
    %53 = vector.multi_reduction <add>, %52, %cst_20 [1] : vector<1x256xf32> to vector<1xf32>
    %54 = vector.shape_cast %53 : vector<1xf32> to vector<1x1xf32>
    %c0_21 = arith.constant 0 : index
    %c0_22 = arith.constant 0 : index
    %c0_23 = arith.constant 0 : index
    %c0_24 = arith.constant 0 : index
    %55 = vector.load %arg6[%c0_21, %c0_22, %c0_23, %c0_24] : memref<1x1x1x1xf32, #tpu.memory_space<vmem>>, vector<1x1x1x1xf32>
    %56 = vector.shape_cast %55 : vector<1x1x1x1xf32> to vector<1x1xf32>
    %57 = vector.shape_cast %54 : vector<1x1xf32> to vector<1x1x1x1xf32>
    tpu.vector_store %arg6[%c0_21, %c0_22, %c0_23, %c0_24], %57 {strides = array<i32>} : memref<1x1x1x1xf32, #tpu.memory_space<vmem>>, vector<1x1x1x1xf32>,
    %c0_25 = arith.constant 0 : index
    %58 = memref.load %arg2[%c0_25] : memref<1xi32, #tpu.memory_space<smem>>
    %59 = vector.broadcast %58 : i32 to vector<1x256xi32>
    %60 = arith.select %11, %59, %3 : vector<1x256xi1>, vector<1x256xi32>
    %61 = vector.broadcast %60 : vector<1x256xi32> to vector<4x256xi32>
    %62 = arith.cmpi eq, %24, %61 : vector<4x256xi32>
    %63 = vector.broadcast %9 : vector<1x256xi1> to vector<4x256xi1>
    %64 = arith.andi %62, %63 : vector<4x256xi1>
    %65 = arith.extui %64 : vector<4x256xi1> to vector<4x256xi32>
    %66 = arith.sitofp %65 : vector<4x256xi32> to vector<4x256xf32>
    %cst_26 = arith.constant 0.000000e+00 : f32
    %67 = vector.shape_cast %9 : vector<1x256xi1> to vector<1x256xi1>
    %68 = vector.broadcast %67 : vector<1x256xi1> to vector<4x256xi1>
    %69 = vector.broadcast %cst_26 : f32 to vector<4x256xf32>
    %70 = arith.select %68, %23, %69 : vector<4x256xi1>, vector<4x256xf32>
    %cst_27 = arith.constant dense<0.000000e+00> : vector<4xf32>
    %71 = vector.multi_reduction <add>, %66, %cst_27 [1] : vector<4x256xf32> to vector<4xf32>
    %72 = vector.shape_cast %71 : vector<4xf32> to vector<4x1xf32>
    %c0_28 = arith.constant 0 : index
    %c0_29 = arith.constant 0 : index
    %c0_30 = arith.constant 0 : index
    %c0_31 = arith.constant 0 : index
    %73 = vector.load %arg7[%c0_28, %c0_29, %c0_30, %c0_31] : memref<1x1x4x1xf32, #tpu.memory_space<vmem>>, vector<1x1x4x1xf32>
    %74 = vector.shape_cast %73 : vector<1x1x4x1xf32> to vector<4x1xf32>
    %75 = vector.shape_cast %72 : vector<4x1xf32> to vector<1x1x4x1xf32>
    tpu.vector_store %arg7[%c0_28, %c0_29, %c0_30, %c0_31], %75 {strides = array<i32>} : memref<1x1x4x1xf32, #tpu.memory_space<vmem>>, vector<1x1x4x1xf32>,
    %76 = arith.mulf %70, %66 : vector<4x256xf32>
    %cst_32 = arith.constant dense<0.000000e+00> : vector<4xf32>
    %77 = vector.multi_reduction <add>, %76, %cst_32 [1] : vector<4x256xf32> to vector<4xf32>
    %78 = vector.shape_cast %77 : vector<4xf32> to vector<4x1xf32>
    %c0_33 = arith.constant 0 : index
    %c0_34 = arith.constant 0 : index
    %c0_35 = arith.constant 0 : index
    %c0_36 = arith.constant 0 : index
    %79 = vector.load %arg8[%c0_33, %c0_34, %c0_35, %c0_36] : memref<1x1x4x1xf32, #tpu.memory_space<vmem>>, vector<1x1x4x1xf32>
    %80 = vector.shape_cast %79 : vector<1x1x4x1xf32> to vector<4x1xf32>
    %81 = vector.shape_cast %78 : vector<4x1xf32> to vector<1x1x4x1xf32>
    tpu.vector_store %arg8[%c0_33, %c0_34, %c0_35, %c0_36], %81 {strides = array<i32>} : memref<1x1x4x1xf32, #tpu.memory_space<vmem>>, vector<1x1x4x1xf32>,
    %cst_37 = arith.constant dense<0.000000e+00> : vector<4xf32>
    %82 = vector.multi_reduction <add>, %70, %cst_37 [1] : vector<4x256xf32> to vector<4xf32>
    %83 = vector.shape_cast %82 : vector<4xf32> to vector<4x1xf32>
    %c0_38 = arith.constant 0 : index
    %c0_39 = arith.constant 0 : index
    %c0_40 = arith.constant 0 : index
    %c0_41 = arith.constant 0 : index
    %84 = vector.load %arg9[%c0_38, %c0_39, %c0_40, %c0_41] : memref<1x1x4x1xf32, #tpu.memory_space<vmem>>, vector<1x1x4x1xf32>
    %85 = vector.shape_cast %84 : vector<1x1x4x1xf32> to vector<4x1xf32>
    %86 = vector.shape_cast %83 : vector<4x1xf32> to vector<1x1x4x1xf32>
    tpu.vector_store %arg9[%c0_38, %c0_39, %c0_40, %c0_41], %86 {strides = array<i32>} : memref<1x1x4x1xf32, #tpu.memory_space<vmem>>, vector<1x1x4x1xf32>,
    return
  }
  func.func @transform_0(%arg0: i32, %arg1: i32, %arg2: memref<1xi32, #tpu.memory_space<smem>>) -> (i32, i32, i32) {
    %c0_i32 = arith.constant 0 : i32
    %c0_i32_0 = arith.constant 0 : i32
    return %arg0, %c0_i32, %arg1 : i32, i32, i32
  }
  func.func @transform_1(%arg0: i32, %arg1: i32, %arg2: memref<1xi32, #tpu.memory_space<smem>>) -> (i32, i32, i32) {
    %c0_i32 = arith.constant 0 : i32
    %c0_i32_0 = arith.constant 0 : i32
    return %arg0, %c0_i32, %arg1 : i32, i32, i32
  }
  func.func @transform_2(%arg0: i32, %arg1: i32, %arg2: memref<1xi32, #tpu.memory_space<smem>>) -> (i32, i32, i32, i32) {
    %c0_i32 = arith.constant 0 : i32
    %c0_i32_0 = arith.constant 0 : i32
    %c0_i32_1 = arith.constant 0 : i32
    return %arg0, %arg1, %c0_i32, %c0_i32_0 : i32, i32, i32, i32
  }
  func.func @transform_3(%arg0: i32, %arg1: i32, %arg2: memref<1xi32, #tpu.memory_space<smem>>) -> (i32, i32, i32, i32) {
    %c0_i32 = arith.constant 0 : i32
    %c0_i32_0 = arith.constant 0 : i32
    %c0_i32_1 = arith.constant 0 : i32
    return %arg0, %arg1, %c0_i32, %c0_i32_0 : i32, i32, i32, i32
  }
  func.func @transform_4(%arg0: i32, %arg1: i32, %arg2: memref<1xi32, #tpu.memory_space<smem>>) -> (i32, i32, i32, i32) {
    %c0_i32 = arith.constant 0 : i32
    %c0_i32_0 = arith.constant 0 : i32
    %c0_i32_1 = arith.constant 0 : i32
    return %arg0, %arg1, %c0_i32, %c0_i32_0 : i32, i32, i32, i32
  }
  func.func @transform_5(%arg0: i32, %arg1: i32, %arg2: memref<1xi32, #tpu.memory_space<smem>>) -> (i32, i32, i32, i32) {
    %c0_i32 = arith.constant 0 : i32
    %c0_i32_0 = arith.constant 0 : i32
    %c0_i32_1 = arith.constant 0 : i32
    return %arg0, %arg1, %c0_i32, %c0_i32_0 : i32, i32, i32, i32
  }
  func.func @transform_6(%arg0: i32, %arg1: i32, %arg2: memref<1xi32, #tpu.memory_space<smem>>) -> (i32, i32, i32, i32) {
    %c0_i32 = arith.constant 0 : i32
    %c0_i32_0 = arith.constant 0 : i32
    %c0_i32_1 = arith.constant 0 : i32
    return %arg0, %arg1, %c0_i32, %c0_i32_0 : i32, i32, i32, i32
  }
}

</mosaic_0001>

<bundles_post_ra>
// kernel: tpu_custom_call.1
= control target key start
LH: loop header
LB: loop body
LE: loop exit
PB: predicated region body
PF: predicated region fallthrough
CT: control target
= control target key end

     0   :  { %s1371_s0 = inlined_call_operand.<no memory space> [shape: s32[1], index: 0, kind: input, shape index: {}]   ;;  %s1372_s1 = inlined_call_operand.hbm [shape: f32[2,4,256], index: 1, kind: input, shape index: {}]   ;;  %s1373_s2 = inlined_call_operand.hbm [shape: s32[2,1,256], index: 2, kind: input, shape index: {}]   ;;  %s1374_s3 = inlined_call_operand.vmem [shape: f32[2,1,1,1], index: 3, kind: output, shape index: {0}]   ;;  %s1375_s4 = inlined_call_operand.vmem [shape: f32[2,1,1,1], index: 4, kind: output, shape index: {1}]   ;;  %s1376_s5 = inlined_call_operand.vmem [shape: f32[2,1,4,1], index: 5, kind: output, shape index: {2}]   ;;  %s1377_s6 = inlined_call_operand.vmem [shape: f32[2,1,4,1], index: 6, kind: output, shape index: {3}]   ;;  %s1378_s7 = inlined_call_operand.vmem [shape: f32[2,1,4,1], index: 7, kind: output, shape index: {4}]  }
   0x1   :  { %13 = sst [smem:[#allocation3]] %s1371_s0 }
   0x2   :  { %14 = vsyncpa [#allocation5], 0 }
   0x3   :  { %16 = vsyncpa [#allocation5 + $0x1], 0 }
   0x4   :  { %17 = vsyncpa [#allocation7], 0 }
   0x5   :  { %19 = vsyncpa [#allocation7 + $0x1], 0  ;;  %s1175_s26 = smov 0   ;;  %s1177_s27 = smov 0  }
   0x6   :  { %s1179_s28 = smov 0   ;;  %s1181_s29 = smov 0  }
   0x7   :  { %s1183_s30 = smov 0   ;;  %s1185_s8 = smov 0  }
   0x8 LB: > { %s918_s0 = sadd.s32 4294967295, %s1124_s8   ;;  %s37_s9 = sadd.s32 1, %s1120_s30  ;;  %s1124_s8 = sphi %s1185_s8, %s25_s8   ;;  %s1120_s30 = sphi %s1183_s30, %s1393_s30   ;;  %s1116_s29 = sphi %s1181_s29, %s1392_s29   ;;  %s1112_s28 = sphi %s1179_s28, %s1391_s28   ;;  %s1108_s27 = sphi %s1177_s27, %s1390_s27   ;;  %s1104_s26 = sphi %s1175_s26, %s1389_s26  }
   0x9   : > { %p39_p0 = scmp.ge.s32.totalorder %s37_s9, 2  ;;  %s46_s10 = sadd.s32 1, %s1112_s28 }
   0xa   : > { %p53_p1 = scmp.ne.s32.totalorder %s1112_s28, %s1108_s27  ;;  %p54_p2 = scmp.eq.s32.totalorder %s1124_s8, 0 }
   0xb   : > { %s1395_s9 = smov (%p39_p0, %s37_s9), 0  ;;  %p59_p4 = scmp.ne.s32.totalorder %s1108_s27, %s1104_s26 }
   0xc   : > { %p1211_p3 = por %p54_p2, %p53_p1  ;;  %s41_s12 = ssub.s32 %s1120_s30, %s1395_s9 }
   0xd   : > { %p60_p5 = scmp.eq.s32.totalorder %s918_s0, 0  ;;  %p44_p6 = scmp.eq.s32.totalorder %s41_s12, 0 }
   0xe   : > { %p952_p8 = scmp.lt.s32.totalorder %s1124_s8, 2  ;;  %s1227_s15 = sand.u32 1, %s1112_s28  }
   0xf   : > { %p1218_p7 = por %p60_p5, %p59_p4  ;;  %s939_s16 = sshll.u32 %s1120_s30, 7 }
  0x10   : > { %s1224_s14 = scalar_select %p44_p6, %s1112_s28, %s46_s10  }
  0x11   : > { %s922_s17 = sshll.u32 %s1227_s15, 3  ;;  %s263_s20 = scalar_lea.hbm %s1372_s1, %s939_s16 }
  0x12   : > { %s255_s21 = scalar_lea.vmem [#allocation4], %s922_s17  ;;  %p1236_p9 = pnand %p952_p8, %p1211_p3 }
  0x13   : > { %s265_s22 = sshll.u32 %s255_s21, 4  ;;  %p928_p10 = scmp.ge.s32.totalorder %s1124_s8, 1  ;;  %s266_s22 = int_to_ptr.vmem [resolvable:$true] %s265_s22 }
  0x14   : > { %p291_p11 = scmp.lt.s32.totalorder %s1124_s8, 3  ;;  %s252_s24 = scalar_lea.sflag [#allocation5], %s1227_s15 }
  0x15   : > { %p1016_p12 = pneg %p1236_p9  ;;  %s1027_s25 = scalar_lea.vmem %s266_s22, 128 }
  0x16   : > { %p1028_p13 = scmp.ne.s32.totalorder %s266_s22, %s1027_s25  ;;  %s1126_s26 = smov [#allocation4]  }
  0x17   : > { %s1032_s0 = sshll.u32 %s1126_s26, 4  ;;  %s1033_s0 = int_to_ptr.vmem [resolvable:$false] %s1032_s0 }
  0x18   : > { %p1030_p0 = pnand %p1028_p13, %p1016_p12  ;;  %s1034_s10 = scalar_lea.vmem %s1033_s0, 256 }
  0x19   : > { %p1035_p2 = scmp.lt.s32.totalorder %s266_s22, %s1033_s0  ;;  %p1036_p3 = scmp.lt.s32.totalorder %s1034_s10, %s1027_s25 }
  0x1a   : > { %p1031_p1 = pneg %p1030_p0 }
  0x1b   : > { %p1037_p4 = por %p1036_p3, %p1035_p2 }
  0x1d   : > { %p1038_p5 = pnand %p1037_p4, %p1031_p1 }
  0x1f   : > { %1041 = shalt.err (!%p1038_p5)
}
  0x20   : > { %948 = dma.hbm_to_vmem [thread:$0]  (!%p1236_p9), %s263_s20, 128, %s266_s22, %s252_s24  }
  0x21   : > { %p1254_p6 = pnand %p928_p10, %p291_p11  ;;  %s925_s12 = sshll.u32 %s1227_s15, 1 }
  0x22   : > { %s940_s16 = sshll.u32 %s1120_s30, 5  ;;  %s276_s21 = scalar_lea.vmem [#allocation6], %s925_s12 }
  0x23   : > { %s284_s19 = scalar_lea.hbm %s1373_s2, %s940_s16  ;;  %s286_s25 = sshll.u32 %s276_s21, 4  ;;  %s287_s25 = int_to_ptr.vmem [resolvable:$true] %s286_s25 }
  0x24   : > { %s273_s26 = scalar_lea.sflag [#allocation7], %s1227_s15  ;;  %s1055_s0 = scalar_lea.vmem %s287_s25, 32 }
  0x25   : > { %p1056_p8 = scmp.ne.s32.totalorder %s287_s25, %s1055_s0  ;;  %s1127_s20 = smov [#allocation6]  }
  0x26   : > { %s1060_s22 = sshll.u32 %s1127_s20, 4  ;;  %s1061_s22 = int_to_ptr.vmem [resolvable:$false] %s1060_s22 }
  0x27   : > { %p1058_p13 = pnand %p1056_p8, %p1016_p12  ;;  %s1062_s24 = scalar_lea.vmem %s1061_s22, 64 }
  0x28   : > { %p1063_p10 = scmp.lt.s32.totalorder %s287_s25, %s1061_s22  ;;  %p1064_p11 = scmp.lt.s32.totalorder %s1062_s24, %s1055_s0 }
  0x29   : > { %p1059_p0 = pneg %p1058_p13 }
  0x2a   : > { %p1065_p1 = por %p1064_p11, %p1063_p10 }
  0x2c   : > { %p1066_p2 = pnand %p1065_p1, %p1059_p0 }
  0x2e   : > { %1069 = shalt.err (!%p1066_p2)
}
  0x2f   : > { %951 = dma.hbm_to_vmem [thread:$0]  (!%p1236_p9), %s284_s19, 32, %s287_s25, %s273_s26  }
  0x30   : > { %295 = sbr.rel (%p1254_p6) target bundleno = 307 (0x133), region = 28  ;;  %s297_s15 = sand.u32 (!%p1254_p6), 1, %s1108_s27  }
  0x31   : > { %s929_s10 = sshll.u32 (!%p1254_p6), %s297_s15, 3  ;;  %s298_s12 = scalar_lea.sflag (!%p1254_p6), [#allocation5], %s297_s15 }
  0x32   : > { %s301_s16 = scalar_lea.vmem (!%p1254_p6), [#allocation4], %s929_s10 }
  0x35   : > { %1095 = dma.done.wait (%p1218_p7), %s298_s12, 128  }
  0x36   : > { %1097 = vsyncadd (%p1218_p7), %s298_s12, 4294967168  ;;  %s930_s17 = sshll.u32 %s297_s15, 1  ;;  %s307_s18 = scalar_lea.sflag [#allocation7], %s297_s15 }
  0x37   : > { %s310_s21 = scalar_lea.vmem [#allocation6], %s930_s17 }
  0x38   : > { %1099 = dma.done.wait (%p1218_p7), %s307_s18, 32  }
  0x39   : > { %1101 = vsyncadd (%p1218_p7), %s307_s18, 4294967264  ;;  %v476_v0 = vlaneseq  ;;  %s607_s23 = sld [smem:[#allocation3]]  ;;  %v1128_v2 = vmov 1966171168   ;;  %v1129_v4 = vmov 1   ;;  %vm422_vm0 = vcmask 1043456  }
  0x3a   : > { %v535_v3 = vunpack.c.l.s4 %v1128_v2  ;;  %v533_v5 = vcombine.low %v1129_v4, %v1129_v4  ;;  %v408_v10 = vld [vmem:[%s310_s21] sm:$0x3]  ;;  %v407_v11 = vld [vmem:[%s301_s16] sm:$0xff]  ;;  %vm1130_vm2 = vmmov 1   ;;  %vm580_vm10 = vcmask 1040384   ;;  %p374_p7 = scmp.lt.s32.totalorder %s1116_s29, 1 }
  0x3b   : > { %v477_v1 = vshrl.u32 %v476_v0, 7  ;;  %vm418_vm1 = vcmp.eq.s32.totalorder %v408_v10, 255  ;;  %v420_v14 = vcombine.high %v407_v11, %v407_v11  ;;  %v423_v15 = vsel %vm422_vm0, %v407_v11, -inf }
  0x3c   : > { %v536_v6 = vunpack.c.0.s8 %v535_v3  ;;  %v424_v16 = vrot.slane %v423_v15, 4  ;;  %v478_v17 = vsel %vm418_vm1, 0, %v408_v10  ;;  %vm530_vm3 = vmxor %vm418_vm1, %vm1130_vm2  ;;  %v1131_v32 = vmov 0.0   ;;  %s1397_s29 = smov (!%p374_p7, %s1116_s29), 1 }
  0x3d   : > { %v1280_v7 = vsub.s32 0, %v477_v1  ;;  %v1282_v8 = vsub.s32 1, %v477_v1  ;;  %v430_v20 = vsel %vm422_vm0, %v420_v14, -inf  ;;  %s931_s13 = sshll.u32 %s1397_s29, 2  ;;  %s385_s25 = scalar_lea.vmem %s1375_s4, %s1397_s29  ;;  %vm586_vm11 = vcmask 0  }
  0x3e   : > { %v1284_v9 = vsub.s32 %v536_v6, %v477_v1  ;;  %v425_v23 = vmax.f32 %v423_v15, %v424_v16  ;;  %v431_v24 = vrot.slane %v430_v20, 4  ;;  %s392_s20 = scalar_lea.vmem %s1376_s5, %s931_s13  ;;  %vm638_vm12 = vcmask 3072   ;;  %s399_s15 = scalar_lea.vmem %s1377_s6, %s931_s13 }
  0x3f   : > { %v608_v12 = vstv %s607_s23  ;;  %v482_v21 = vrot.slane %v478_v17, %v1280_v7  ;;  %v486_v22 = vrot.slane %v478_v17, %v1282_v8  ;;  %s379_s16 = scalar_lea.vmem %s1374_s3, %s1397_s29  ;;  %s406_s21 = scalar_lea.vmem %s1378_s7, %s931_s13 }
  0x40   : > { %v540_v13 = vrot.slane %v533_v5, %v1284_v9  ;;  %v609_v18 = vsel %vm418_vm1, %v608_v12, %v408_v10  ;;  %v426_v30 = vrot.slane %v425_v23, 2  ;;  %v432_v31 = vmax.f32 %v430_v20, %v431_v24 }
  0x41   : > { %v613_v25 = vrot.slane %v609_v18, %v1280_v7  ;;  %v617_v26 = vrot.slane %v609_v18, %v1282_v8  ;;  %vm1294_vm5 = vcmp.eq.s32.totalorder %v477_v1, %v482_v21  ;;  %vm1298_vm6 = vcmp.eq.s32.totalorder %v477_v1, %v486_v22 }
  0x42   : > { %v547_v19 = vrot.slane %v540_v13, %v1284_v9  ;;  %v427_v38 = vmax.f32 %v425_v23, %v426_v30  ;;  %v433_v39 = vrot.slane %v432_v31, 2 }
  0x43   : > { %vm618_vm8 = vcmp.eq.s32.totalorder %v477_v1, %v613_v25  ;;  %vm619_vm9 = vcmp.eq.s32.totalorder %v477_v1, %v617_v26 }
  0x44   : > { %vm548_vm4 = vcmp.ne.s32.totalorder %v547_v19, 0  ;;  %v935_v34 = vsel %vm618_vm8, 1.0, %v1131_v32  ;;  %v936_v35 = vsel %vm619_vm9, 1.0, %v1131_v32  ;;  %v428_v44 = vrot.slane %v427_v38, 1 }
  0x45   : > { %vm1302_vm7 = vmand %vm530_vm3, %vm548_vm4  ;;  %v633_v40 = vsel %vm422_vm0, %v935_v34, 0.0  ;;  %v634_v41 = vsel %vm422_vm0, %v936_v35, 0.0  ;;  %v434_v45 = vmax.f32 %v432_v31, %v433_v39 }
  0x46   : > { %v934_v33 = vsel %vm1302_vm7, 1.0, %v1131_v32  ;;  %v635_v47 = vadd.f32 %v634_v41, %v633_v40  ;;  %v429_v48 = vmax.f32 %v427_v38, %v428_v44 }
  0x47   : > { %v594_v36 = vrot.slane %v934_v33, %v1280_v7  ;;  %v598_v37 = vrot.slane %v934_v33, %v1282_v8  ;;  %v435_v49 = vrot.slane %v434_v45, 1 }
  0x48   : > { %636 = vadd.xlane.f32.xlu1 %v635_v47 }
  0x49   : > { %v601_v42 = vsel %vm580_vm10, %v594_v36, 0.0  ;;  %v602_v43 = vsel %vm580_vm10, %v598_v37, 0.0  ;;  %v436_v50 = vmax.f32 %v434_v45, %v435_v49 }
  0x4a   : > { %v603_v46 = vadd.f32 %v602_v43, %v601_v42 }
  0x4b   : > { %v439_v51 = vcombine.low %v429_v48, %v436_v50 }
  0x4c   : > { %604 = vadd.xlane.f32.xlu0 %v603_v46 }
  0x4d   : > { %v441_v52 = vsub.f32 %v407_v11, %v439_v51 }
  0x4f   : > { %v442_v53 = vmul.f32 1.442695, %v441_v52 }
  0x51   : > { %1006 = vpow2.f32 %v442_v53 }
  0x5e   : > { %v1007_v54 = vpop.eup %1006 }
  0x5f   : > { %v445_v55 = vcombine.high %v1007_v54, %v1007_v54  ;;  %v447_v56 = vsel %vm422_vm0, %v1007_v54, 0.0 }
  0x60   : > { %v448_v57 = vrot.slane %v447_v56, 4 }
  0x61   : > { %v454_v58 = vsel %vm422_vm0, %v445_v55, 0.0 }
  0x62   : > { %v449_v59 = vadd.f32 %v448_v57, %v447_v56  ;;  %v455_v60 = vrot.slane %v454_v58, 4 }
  0x64   : > { %v450_v61 = vrot.slane %v449_v59, 2  ;;  %v456_v62 = vadd.f32 %v455_v60, %v454_v58 }
  0x66   : > { %v451_v63 = vadd.f32 %v450_v61, %v449_v59  ;;  %v457_v0 = vrot.slane %v456_v62, 2 }
  0x68   : > { %v452_v1 = vrot.slane %v451_v63, 1  ;;  %v458_v2 = vadd.f32 %v457_v0, %v456_v62 }
  0x6a   : > { %v453_v3 = vadd.f32 %v452_v1, %v451_v63  ;;  %v459_v4 = vrot.slane %v458_v2, 1 }
  0x6c   : > { %v460_v5 = vadd.f32 %v459_v4, %v458_v2  ;;  %1008 = vlog2.f32 %v453_v3 }
  0x6e   : > { %1010 = vlog2.f32 %v460_v5  ;;  %v472_v6 = vcombine.low %v453_v3, %v460_v5 }
  0x70   : > { %1012 = vrcp.f32 %v472_v6 }
  0x79   : > { %v1009_v10 = vpop.eup %1008 }
  0x7a   : > { %v462_v11 = vmul.f32 0.6931472, %v1009_v10 }
  0x7b   : > { %v1011_v12 = vpop.eup %1010 }
  0x7c   : > { %v464_v13 = vmul.f32 0.6931472, %v1011_v12 }
  0x7d   : > { %v1013_v14 = vpop.eup %1012 }
  0x7e   : > { %v467_v15 = vcombine.low %v462_v11, %v464_v13  ;;  %v475_v16 = vmul.f32 %v1013_v14, %v1007_v54 }
  0x80   : > { %v469_v17 = vsub.f32 %v441_v52, %v467_v15  ;;  %v629_v18 = vcombine.high %v475_v16, %v475_v16  ;;  %v640_v19 = vmul.f32 %v935_v34, %v475_v16  ;;  %v648_v11 = vsel %vm422_vm0, %v475_v16, 0.0 }
  0x82   : > { %v490_v20 = vcombine.high %v469_v17, %v469_v17  ;;  %v506_v21 = vsel %vm1294_vm5, %v469_v17, 0.0  ;;  %v641_v22 = vmul.f32 %v936_v35, %v629_v18  ;;  %v492_v23 = vsel %vm422_vm0, %v469_v17, 0.0 }
  0x83   : > { %v508_v24 = vsel %vm422_vm0, %v506_v21, 0.0  ;;  %v493_v25 = vrot.slane %v492_v23, 4  ;;  %v642_v26 = vsel %vm422_vm0, %v640_v19, 0.0  ;;  %v649_v12 = vsel %vm422_vm0, %v629_v18, 0.0 }
  0x84   : > { %v499_v30 = vsel %vm422_vm0, %v490_v20, 0.0  ;;  %v507_v31 = vsel %vm1298_vm6, %v490_v20, 0.0  ;;  %v509_v32 = vrot.slane %v508_v24, 4  ;;  %v643_v33 = vsel %vm422_vm0, %v641_v22, 0.0 }
  0x85   : > { %v500_v34 = vrot.slane %v499_v30, 4  ;;  %v515_v27 = vsel %vm422_vm0, %v507_v31, 0.0  ;;  %v494_v36 = vadd.f32 %v493_v25, %v492_v23  ;;  %v644_v35 = vadd.f32 %v643_v33, %v642_v26 }
  0x86   : > { %v510_v37 = vadd.f32 %v509_v32, %v508_v24  ;;  %v516_v38 = vrot.slane %v515_v27, 4  ;;  %v650_v14 = vadd.f32 %v649_v12, %v648_v11 }
  0x87   : > { %v501_v39 = vadd.f32 %v500_v34, %v499_v30  ;;  %v495_v40 = vrot.slane %v494_v36, 2  ;;  %645 = vadd.xlane.f32.xlu1 %v644_v35 }
  0x88   : > { %v511_v41 = vrot.slane %v510_v37, 2  ;;  %v517_v42 = vadd.f32 %v516_v38, %v515_v27 }
  0x89   : > { %v496_v43 = vadd.f32 %v495_v40, %v494_v36  ;;  %v502_v44 = vrot.slane %v501_v39, 2 }
  0x8a   : > { %v518_v45 = vrot.slane %v517_v42, 2  ;;  %v512_v28 = vadd.f32 %v511_v41, %v510_v37 }
  0x8b   : > { %v497_v46 = vrot.slane %v496_v43, 1  ;;  %v503_v47 = vadd.f32 %v502_v44, %v501_v39 }
  0x8c   : > { %v513_v48 = vrot.slane %v512_v28, 1  ;;  %v519_v49 = vadd.f32 %v518_v45, %v517_v42 }
  0x8d   : > { %v498_v50 = vadd.f32 %v497_v46, %v496_v43  ;;  %v504_v51 = vrot.slane %v503_v47, 1 }
  0x8e   : > { %v514_v52 = vadd.f32 %v513_v48, %v512_v28  ;;  %v520_v53 = vrot.slane %v519_v49, 1 }
  0x8f   : > { %v505_v54 = vadd.f32 %v504_v51, %v503_v47  ;;  %v522_v55 = vmul.f32 0.025, %v498_v50 }
  0x90   : > { %v521_v56 = vadd.f32 %v520_v53, %v519_v49  ;;  %v524_v57 = vmul.f32 0.875, %v514_v52 }
  0x91   : > { %v523_v58 = vmul.f32 0.025, %v505_v54 }
  0x92   : > { %v525_v59 = vmul.f32 0.875, %v521_v56  ;;  %v526_v60 = vadd.f32 %v524_v57, %v522_v55 }
  0x94   : > { %v527_v61 = vadd.f32 %v525_v59, %v523_v58  ;;  %v528_v62 = vsub.f32 0.0, %v526_v60 }
  0x96   : > { %v529_v63 = vsub.f32 0.0, %v527_v61 }
  0x98   : > { %v552_v0 = vcombine.low %v528_v62, %v529_v63 }
  0x9a   : > { %v559_v1 = vrot.slane %v552_v0, %v1284_v9 }
  0x9c   : > { %v566_v2 = vrot.slane %v559_v1, %v1284_v9 }
  0x9e   : > { %v568_v3 = vsel %vm1302_vm7, %v566_v2, 0.0 }
  0x9f   : > { %v573_v4 = vrot.slane %v568_v3, %v1280_v7  ;;  %v577_v5 = vrot.slane %v568_v3, %v1282_v8 }
  0xa1   : > { %v581_v6 = vsel %vm580_vm10, %v573_v4, 0.0  ;;  %v582_v10 = vsel %vm580_vm10, %v577_v5, 0.0 }
  0xa2   : > { %v583_v13 = vadd.f32 %v582_v10, %v581_v6 }
  0xa4   : > { %584 = vadd.xlane.f32.xlu0 %v583_v13 }
  0xa8   : > { %651 = vadd.xlane.f32.xlu0 %v650_v14 }
  0xd1   : > { %v637_v8 = vpop.xlane.xlu1 %636 }
  0xd2   : > { %639 = vst.msk [vmem:[%s392_s20] sm:$0xf] %vm638_vm12, %v637_v8 }
  0xd5   : > { %v605_v7 = vpop.xlane.xlu0 %604 }
  0xd6   : > { %606 = vst.msk [vmem:[%s385_s25] sm:$0x1] %vm586_vm11, %v605_v7 }
 0x110   : > { %v646_v9 = vpop.xlane.xlu1 %645 }
 0x111   : > { %647 = vst.msk [vmem:[%s399_s15] sm:$0xf] %vm638_vm12, %v646_v9 }
 0x12d   : > { %v585_v29 = vpop.xlane.xlu0 %584 }
 0x12e   : > { %587 = vst.msk [vmem:[%s379_s16] sm:$0x1] %vm586_vm11, %v585_v29 }
 0x131   : > { %v652_v15 = vpop.xlane.xlu0 %651 }
 0x132   : > { %653 = vst.msk [vmem:[%s406_s21] sm:$0xf] %vm638_vm12, %v652_v15 }
 0x133 PF: > { %s25_s8 = sadd.s32 1, %s1124_s8   ;;  %s1389_s26 = smov %s1108_s27 }
 0x134   : > { %p22_p9 = scmp.ge.s32.totalorder %s25_s8, 4   ;;  %s1390_s27 = smov %s1112_s28 }
 0x135   : > { %s1391_s28 = smov %s1224_s14  ;;  %s1392_s29 = smov %s1120_s30 }
 0x136   : > { %s1393_s30 = smov %s1395_s9  ;;  %24 = sbr.rel (!%p22_p9) target bundleno = 8 (0x8), region = 129 }
 0x13b   :  { %755 = vsyncpa [#allocation5], 1 }
 0x13c   :  { %757 = vsyncpa [#allocation5 + $0x1], 1 }
 0x13d   :  { %758 = vsyncpa [#allocation7], 1 }
 0x13e   :  { %760 = vsyncpa [#allocation7 + $0x1], 1 }

</bundles_post_ra>
